<compile_context>
chip_gen: v5e
topology: v5e:2x2
jax: 0.10.0
libtpu: 0.0.40
codegen_flags: <defaults>
</compile_context>

<pallas_src>
import functools

import jax
import jax.numpy as jnp
from jax.experimental import pallas as pl
from jax.experimental.pallas import tpu as pltpu

LANE = 128
SUBLANE = 8


def _round_up(x, m):
    return (x + m - 1) // m * m


# ---------------------------------------------------------------------------
# Kernel
# ---------------------------------------------------------------------------
def dueling_dqn_kernel(x_ref,
                       w1_ref, b1_ref, w2_ref, b2_ref,
                       ws1_ref, bs1_ref, ws2_ref, bs2_ref,
                       q_ref, *, compute_dtype):
    f32 = jnp.float32
    x = x_ref[...].astype(compute_dtype)

    # feature_layer: Linear -> ReLU -> Linear -> ReLU   (padded width Hp)
    h = jnp.dot(x, w1_ref[...], preferred_element_type=f32) + b1_ref[...]
    h = jnp.maximum(h, 0.0).astype(compute_dtype)
    h = jnp.dot(h, w2_ref[...], preferred_element_type=f32) + b2_ref[...]
    h = jnp.maximum(h, 0.0).astype(compute_dtype)

    # fused value|advantage hidden layer: one matmul -> (B, 2*Hp)
    #   cols [0, Hp)  : value-stream hidden, cols [Hp, 2Hp): advantage hidden
    va = jnp.dot(h, ws1_ref[...], preferred_element_type=f32) + bs1_ref[...]
    va = jnp.maximum(va, 0.0).astype(compute_dtype)

    # ws2/bs2 already contain both stream output layers AND the dueling
    # combine (value + adv - mean(adv)), folded in at pack time, so this
    # matmul produces q directly; padded cols (>= action_dim) are exactly 0.
    q = jnp.dot(va, ws2_ref[...], preferred_element_type=f32) + bs2_ref[...]
    q_ref[...] = q.astype(q_ref.dtype)


# ---------------------------------------------------------------------------
# Tiling / wrapper
# ---------------------------------------------------------------------------
def _choose_block_batch(batch, block_batch):
    padded = _round_up(batch, SUBLANE)
    bb = min(block_batch, padded)
    # v7x has 2 TensorCores: keep >= 2 parallel grid steps whenever possible.
    if bb >= padded and padded >= 2 * SUBLANE:
        bb = padded // 2
    # MXU / pipeline friendly alignment: 256-row multiples for big tiles
    # (v6e/v7x 256x256 MXU), 128 for mid-size (v5e 128x128), 8 otherwise.
    if bb >= 512:
        bb = bb // 256 * 256
    elif bb >= 128:
        bb = bb // 128 * 128
    else:
        bb = max(SUBLANE, bb // SUBLANE * SUBLANE)
    # Prefer a tile that divides the 8-rounded batch so we avoid a wrapper
    # jnp.pad full copy of x; don't shrink below half the target tile for it.
    if padded % bb != 0:
        cand = bb - SUBLANE
        while cand >= max(SUBLANE, bb // 2):
            if padded % cand == 0:
                bb = cand
                break
            cand -= SUBLANE
    return bb


def dueling_dqn_forward(x, packed, *, block_batch=512):
    w1, b1, w2, b2 = packed["w1"], packed["b1"], packed["w2"], packed["b2"]
    ws1, bs1, ws2, bs2 = packed["ws1"], packed["bs1"], packed["ws2"], packed["bs2"]
    action_dim = packed["action_dim"]
    compute_dtype = w1.dtype

    batch, state_dim = x.shape
    qp = ws2.shape[1]

    bb = _choose_block_batch(batch, block_batch)
    padded_batch = _round_up(batch, bb)
    if padded_batch != batch:
        # Only hit when batch has a ragged (non tile-divisible) tail.
        x = jnp.pad(x, ((0, padded_batch - batch), (0, 0)))
    x = x.astype(compute_dtype)  # halves x DMA bytes on the bf16 path

    grid = (padded_batch // bb,)
    const_map = lambda i: (0, 0)
    # Constant block index -> single-buffered: no dead second pipeline buffer.
    weight_specs = [
        pl.BlockSpec(w.shape, const_map, pipeline_mode=pl.Buffered(1))
        for w in (w1, b1, w2, b2, ws1, bs1, ws2, bs2)
    ]

    kernel = functools.partial(dueling_dqn_kernel, compute_dtype=compute_dtype)

    q_padded = pl.pallas_call(
        kernel,
        # writeback in compute dtype (bf16 fast path) -> ~2x less HBM traffic
        out_shape=jax.ShapeDtypeStruct((padded_batch, qp), compute_dtype),
        grid=grid,
        in_specs=[pl.BlockSpec((bb, state_dim), lambda i: (i, 0))] + weight_specs,
        out_specs=pl.BlockSpec((bb, qp), lambda i: (i, 0)),
        compiler_params=pltpu.CompilerParams(
            dimension_semantics=("parallel",)),
    )(x, w1, b1, w2, b2, ws1, bs1, ws2, bs2)

    # TODO(synk): consumers that only need argmax_a q could read the padded
    # (batch, 128) slab directly with cols >= action_dim masked, skipping this
    # slice pass entirely.
    return q_padded[:batch, :action_dim]


# ---------------------------------------------------------------------------
# Parameter construction / packing
# ---------------------------------------------------------------------------
def init_base_params(key, state_dim, action_dim, hidden_dim):
    """Deterministic synthetic parameters, PyTorch-layer shapes, (in,out) layout."""
    keys = jax.random.split(key, 6)

    def linear(k, fan_in, fan_out):
        kw, kb = jax.random.split(k)
        bound = 1.0 / jnp.sqrt(fan_in)
        w = jax.random.uniform(kw, (fan_in, fan_out), jnp.float32, -bound, bound)
        b = jax.random.uniform(kb, (fan_out,), jnp.float32, -bound, bound)
        return w, b

    w1, b1 = linear(keys[0], state_dim, hidden_dim)
    w2, b2 = linear(keys[1], hidden_dim, hidden_dim)
    wv1, bv1 = linear(keys[2], hidden_dim, hidden_dim)
    wv2, bv2 = linear(keys[3], hidden_dim, 1)
    wa1, ba1 = linear(keys[4], hidden_dim, hidden_dim)
    wa2, ba2 = linear(keys[5], hidden_dim, action_dim)
    return dict(w1=w1, b1=b1, w2=w2, b2=b2,
                wv1=wv1, bv1=bv1, wv2=wv2, bv2=bv2,
                wa1=wa1, ba1=ba1, wa2=wa2, ba2=ba2)


def pack_params(p, state_dim, action_dim, hidden_dim, param_dtype=jnp.bfloat16):
    """Pad to lane boundaries, fuse the value/advantage streams, fold the
    dueling combine into the last weight matrix, cast weights to param_dtype."""
    H = hidden_dim
    A = action_dim
    Hp = _round_up(H, LANE)          # padded hidden width
    Qp = _round_up(A + 1, LANE)      # padded output width

    def padw(w, rows, cols):
        out = jnp.zeros((rows, cols), jnp.float32)
        return out.at[:w.shape[0], :w.shape[1]].set(w)

    w1 = padw(p["w1"], state_dim, Hp)
    b1 = jnp.zeros((1, Hp), jnp.float32).at[0, :H].set(p["b1"])
    w2 = padw(p["w2"], Hp, Hp)
    b2 = jnp.zeros((1, Hp), jnp.float32).at[0, :H].set(p["b2"])

    # fused stream hidden layer: [value_hidden | advantage_hidden]
    ws1 = jnp.zeros((Hp, 2 * Hp), jnp.float32)
    ws1 = ws1.at[:H, :H].set(p["wv1"])
    ws1 = ws1.at[:H, Hp:Hp + H].set(p["wa1"])
    bs1 = jnp.zeros((1, 2 * Hp), jnp.float32)
    bs1 = bs1.at[0, :H].set(p["bv1"])
    bs1 = bs1.at[0, Hp:Hp + H].set(p["ba1"])

    # fused block-diagonal output layer: cols [0,A)=advantage, col A=value
    ws2 = jnp.zeros((2 * Hp, Qp), jnp.float32)
    ws2 = ws2.at[Hp:Hp + H, :A].set(p["wa2"])
    ws2 = ws2.at[:H, A].set(p["wv2"][:, 0])
    bs2 = jnp.zeros((1, Qp), jnp.float32)
    bs2 = bs2.at[0, :A].set(p["ba2"])
    bs2 = bs2.at[0, A].set(p["bv2"][0])

    # Fold the dueling combine q[:,j] = value + adv[:,j] - mean_k adv[:,k]
    # (j < A) into ws2 / bs2; columns >= A of the combine matrix are zero so
    # padded q columns stay exactly zero.
    comb = jnp.zeros((Qp, Qp), jnp.float32)
    comb = comb.at[:A, :A].set(jnp.eye(A, dtype=jnp.float32) - 1.0 / A)
    comb = comb.at[A, :A].set(1.0)
    ws2 = ws2 @ comb
    bs2 = bs2 @ comb

    return dict(
        # MXU inputs in param_dtype (bf16 fast path on v5e/v6e/v7x; f32 exact)
        w1=w1.astype(param_dtype), w2=w2.astype(param_dtype),
        ws1=ws1.astype(param_dtype), ws2=ws2.astype(param_dtype),
        # biases stay f32: added to the f32 MXU accumulator (v5e VPU has no bf16)
        b1=b1, b2=b2, bs1=bs1, bs2=bs2,
        action_dim=action_dim,
    )


def reference_forward(x, p):
    relu = lambda z: jnp.maximum(z, 0.0)
    h = relu(x @ p["w1"] + p["b1"])
    h = relu(h @ p["w2"] + p["b2"])
    value = relu(h @ p["wv1"] + p["bv1"]) @ p["wv2"] + p["bv2"]
    adv = relu(h @ p["wa1"] + p["ba1"]) @ p["wa2"] + p["ba2"]
    return value + (adv - adv.mean(axis=1, keepdims=True))


if __name__ == "__main__":
    batch, state_dim, action_dim, hidden_dim = 24, 16, 4, 32

    key = jax.random.PRNGKey(0)
    kx, kp = jax.random.split(key)
    x = jax.random.normal(kx, (batch, state_dim), jnp.float32)
    base = init_base_params(kp, state_dim, action_dim, hidden_dim)
    q_ref = reference_forward(x, base)

    # exact path (f32 weights/accumulation) -- validates kernel + packing
    # logic tightly; block_batch=8 forces a 3-step batch grid.
    packed_f32 = pack_params(base, state_dim, action_dim, hidden_dim, jnp.float32)
    q_f32 = jax.block_until_ready(dueling_dqn_forward(x, packed_f32, block_batch=8))
    assert q_f32.shape == (batch, action_dim)
    err_f32 = float(jnp.max(jnp.abs(q_f32.astype(jnp.float32) - q_ref)))
    assert jnp.allclose(q_f32.astype(jnp.float32), q_ref, atol=5e-3, rtol=5e-3), err_f32

    # fast path (bf16 weights + bf16 q writeback, f32 accumulation) with the
    # automatic tile selection; looser tolerance for bf16 inputs.
    packed_bf16 = pack_params(base, state_dim, action_dim, hidden_dim, jnp.bfloat16)
    q_bf16 = jax.block_until_ready(dueling_dqn_forward(x, packed_bf16))
    assert q_bf16.shape == (batch, action_dim)
    assert jnp.allclose(q_bf16.astype(jnp.float32), q_ref, atol=1e-1, rtol=1e-1)

    print("KERNEL_OK")
</pallas_src>

<mosaic_0001>
module attributes {stable_mosaic.version = 11 : i64} {
  func.func @dueling_dqn_kernel(%arg0: i32, %arg1: memref<8x16xf32, #tpu.memory_space<vmem>>, %arg2: memref<16x128xf32, #tpu.memory_space<vmem>>, %arg3: memref<1x128xf32, #tpu.memory_space<vmem>>, %arg4: memref<128x128xf32, #tpu.memory_space<vmem>>, %arg5: memref<1x128xf32, #tpu.memory_space<vmem>>, %arg6: memref<128x256xf32, #tpu.memory_space<vmem>>, %arg7: memref<1x256xf32, #tpu.memory_space<vmem>>, %arg8: memref<256x128xf32, #tpu.memory_space<vmem>>, %arg9: memref<1x128xf32, #tpu.memory_space<vmem>>, %arg10: memref<8x128xf32, #tpu.memory_space<vmem>>) attributes {dimension_semantics = [#tpu.dimension_semantics<parallel>], iteration_bounds = array<i64: 3>, scalar_prefetch = 0 : i64, scratch_operands = 0 : i64, tpu.core_type = #tpu.core_type<tc>, window_params = [{transform_indices = @transform_0, window_bounds = array<i64: 8, 16>}, {pipeline_mode = #tpu.pipeline_mode<synchronous>, transform_indices = @transform_1, window_bounds = array<i64: 16, 128>}, {pipeline_mode = #tpu.pipeline_mode<synchronous>, transform_indices = @transform_2, window_bounds = array<i64: 1, 128>}, {pipeline_mode = #tpu.pipeline_mode<synchronous>, transform_indices = @transform_3, window_bounds = array<i64: 128, 128>}, {pipeline_mode = #tpu.pipeline_mode<synchronous>, transform_indices = @transform_4, window_bounds = array<i64: 1, 128>}, {pipeline_mode = #tpu.pipeline_mode<synchronous>, transform_indices = @transform_5, window_bounds = array<i64: 128, 256>}, {pipeline_mode = #tpu.pipeline_mode<synchronous>, transform_indices = @transform_6, window_bounds = array<i64: 1, 256>}, {pipeline_mode = #tpu.pipeline_mode<synchronous>, transform_indices = @transform_7, window_bounds = array<i64: 256, 128>}, {pipeline_mode = #tpu.pipeline_mode<synchronous>, transform_indices = @transform_8, window_bounds = array<i64: 1, 128>}, {transform_indices = @transform_9, window_bounds = array<i64: 8, 128>}]} {
    %c0 = arith.constant 0 : index
    %c0_0 = arith.constant 0 : index
    %0 = vector.load %arg1[%c0, %c0_0] : memref<8x16xf32, #tpu.memory_space<vmem>>, vector<8x16xf32>
    %c0_1 = arith.constant 0 : index
    %c0_2 = arith.constant 0 : index
    %1 = vector.load %arg2[%c0_1, %c0_2] : memref<16x128xf32, #tpu.memory_space<vmem>>, vector<16x128xf32>
    %cst = arith.constant dense<0.000000e+00> : vector<8x128xf32>
    %2 = tpu.matmul %0, %1, %cst {dimension_numbers = #tpu.dot_dimension_numbers<[1], [0], [0], [1], [0, 0, 1, 1], [], []>} : vector<8x16xf32>, vector<16x128xf32>, vector<8x128xf32> -> vector<8x128xf32>
    %c0_3 = arith.constant 0 : index
    %c0_4 = arith.constant 0 : index
    %3 = vector.load %arg3[%c0_3, %c0_4] : memref<1x128xf32, #tpu.memory_space<vmem>>, vector<1x128xf32>
    %4 = vector.broadcast %3 : vector<1x128xf32> to vector<8x128xf32>
    %5 = arith.addf %2, %4 : vector<8x128xf32>
    %cst_5 = arith.constant 0.000000e+00 : f32
    %6 = vector.broadcast %cst_5 : f32 to vector<8x128xf32>
    %7 = arith.maximumf %5, %6 : vector<8x128xf32>
    %c0_6 = arith.constant 0 : index
    %c0_7 = arith.constant 0 : index
    %8 = vector.load %arg4[%c0_6, %c0_7] : memref<128x128xf32, #tpu.memory_space<vmem>>, vector<128x128xf32>
    %cst_8 = arith.constant dense<0.000000e+00> : vector<8x128xf32>
    %9 = tpu.matmul %7, %8, %cst_8 {dimension_numbers = #tpu.dot_dimension_numbers<[1], [0], [0], [1], [0, 0, 1, 1], [], []>} : vector<8x128xf32>, vector<128x128xf32>, vector<8x128xf32> -> vector<8x128xf32>
    %c0_9 = arith.constant 0 : index
    %c0_10 = arith.constant 0 : index
    %10 = vector.load %arg5[%c0_9, %c0_10] : memref<1x128xf32, #tpu.memory_space<vmem>>, vector<1x128xf32>
    %11 = vector.broadcast %10 : vector<1x128xf32> to vector<8x128xf32>
    %12 = arith.addf %9, %11 : vector<8x128xf32>
    %cst_11 = arith.constant 0.000000e+00 : f32
    %13 = vector.broadcast %cst_11 : f32 to vector<8x128xf32>
    %14 = arith.maximumf %12, %13 : vector<8x128xf32>
    %c0_12 = arith.constant 0 : index
    %c0_13 = arith.constant 0 : index
    %15 = vector.load %arg6[%c0_12, %c0_13] : memref<128x256xf32, #tpu.memory_space<vmem>>, vector<128x256xf32>
    %cst_14 = arith.constant dense<0.000000e+00> : vector<8x256xf32>
    %16 = tpu.matmul %14, %15, %cst_14 {dimension_numbers = #tpu.dot_dimension_numbers<[1], [0], [0], [1], [0, 0, 1, 1], [], []>} : vector<8x128xf32>, vector<128x256xf32>, vector<8x256xf32> -> vector<8x256xf32>
    %c0_15 = arith.constant 0 : index
    %c0_16 = arith.constant 0 : index
    %17 = vector.load %arg7[%c0_15, %c0_16] : memref<1x256xf32, #tpu.memory_space<vmem>>, vector<1x256xf32>
    %18 = vector.broadcast %17 : vector<1x256xf32> to vector<8x256xf32>
    %19 = arith.addf %16, %18 : vector<8x256xf32>
    %cst_17 = arith.constant 0.000000e+00 : f32
    %20 = vector.broadcast %cst_17 : f32 to vector<8x256xf32>
    %21 = arith.maximumf %19, %20 : vector<8x256xf32>
    %c0_18 = arith.constant 0 : index
    %c0_19 = arith.constant 0 : index
    %22 = vector.load %arg8[%c0_18, %c0_19] : memref<256x128xf32, #tpu.memory_space<vmem>>, vector<256x128xf32>
    %cst_20 = arith.constant dense<0.000000e+00> : vector<8x128xf32>
    %23 = tpu.matmul %21, %22, %cst_20 {dimension_numbers = #tpu.dot_dimension_numbers<[1], [0], [0], [1], [0, 0, 1, 1], [], []>} : vector<8x256xf32>, vector<256x128xf32>, vector<8x128xf32> -> vector<8x128xf32>
    %c0_21 = arith.constant 0 : index
    %c0_22 = arith.constant 0 : index
    %24 = vector.load %arg9[%c0_21, %c0_22] : memref<1x128xf32, #tpu.memory_space<vmem>>, vector<1x128xf32>
    %25 = vector.broadcast %24 : vector<1x128xf32> to vector<8x128xf32>
    %26 = arith.addf %23, %25 : vector<8x128xf32>
    %c0_23 = arith.constant 0 : index
    %c0_24 = arith.constant 0 : index
    %27 = vector.load %arg10[%c0_23, %c0_24] : memref<8x128xf32, #tpu.memory_space<vmem>>, vector<8x128xf32>
    tpu.vector_store %arg10[%c0_23, %c0_24], %26 {strides = array<i32>} : memref<8x128xf32, #tpu.memory_space<vmem>>, vector<8x128xf32>,
    return
  }
  func.func @transform_0(%arg0: i32) -> (i32, i32) {
    %c0_i32 = arith.constant 0 : i32
    %c0_i32_0 = arith.constant 0 : i32
    return %arg0, %c0_i32 : i32, i32
  }
  func.func @transform_1(%arg0: i32) -> (i32, i32) {
    %c0_i32 = arith.constant 0 : i32
    %c0_i32_0 = arith.constant 0 : i32
    %c0_i32_1 = arith.constant 0 : i32
    return %c0_i32, %c0_i32_0 : i32, i32
  }
  func.func @transform_2(%arg0: i32) -> (i32, i32) {
    %c0_i32 = arith.constant 0 : i32
    %c0_i32_0 = arith.constant 0 : i32
    %c0_i32_1 = arith.constant 0 : i32
    return %c0_i32, %c0_i32_0 : i32, i32
  }
  func.func @transform_3(%arg0: i32) -> (i32, i32) {
    %c0_i32 = arith.constant 0 : i32
    %c0_i32_0 = arith.constant 0 : i32
    %c0_i32_1 = arith.constant 0 : i32
    return %c0_i32, %c0_i32_0 : i32, i32
  }
  func.func @transform_4(%arg0: i32) -> (i32, i32) {
    %c0_i32 = arith.constant 0 : i32
    %c0_i32_0 = arith.constant 0 : i32
    %c0_i32_1 = arith.constant 0 : i32
    return %c0_i32, %c0_i32_0 : i32, i32
  }
  func.func @transform_5(%arg0: i32) -> (i32, i32) {
    %c0_i32 = arith.constant 0 : i32
    %c0_i32_0 = arith.constant 0 : i32
    %c0_i32_1 = arith.constant 0 : i32
    return %c0_i32, %c0_i32_0 : i32, i32
  }
  func.func @transform_6(%arg0: i32) -> (i32, i32) {
    %c0_i32 = arith.constant 0 : i32
    %c0_i32_0 = arith.constant 0 : i32
    %c0_i32_1 = arith.constant 0 : i32
    return %c0_i32, %c0_i32_0 : i32, i32
  }
  func.func @transform_7(%arg0: i32) -> (i32, i32) {
    %c0_i32 = arith.constant 0 : i32
    %c0_i32_0 = arith.constant 0 : i32
    %c0_i32_1 = arith.constant 0 : i32
    return %c0_i32, %c0_i32_0 : i32, i32
  }
  func.func @transform_8(%arg0: i32) -> (i32, i32) {
    %c0_i32 = arith.constant 0 : i32
    %c0_i32_0 = arith.constant 0 : i32
    %c0_i32_1 = arith.constant 0 : i32
    return %c0_i32, %c0_i32_0 : i32, i32
  }
  func.func @transform_9(%arg0: i32) -> (i32, i32) {
    %c0_i32 = arith.constant 0 : i32
    %c0_i32_0 = arith.constant 0 : i32
    return %arg0, %c0_i32 : i32, i32
  }
}

</mosaic_0001>

<bundles_post_ra>
// kernel: tpu_custom_call.1
= control target key start
LH: loop header
LB: loop body
LE: loop exit
PB: predicated region body
PF: predicated region fallthrough
CT: control target
= control target key end

     0   :  { %s1168_s0 = inlined_call_operand.vmem [shape: f32[24,16], index: 0, kind: input, shape index: {}]   ;;  %s1169_s1 = inlined_call_operand.vmem [shape: f32[16,128], index: 1, kind: input, shape index: {}]   ;;  %s1170_s2 = inlined_call_operand.vmem [shape: f32[1,128], index: 2, kind: input, shape index: {}]   ;;  %s1171_s3 = inlined_call_operand.hbm [shape: f32[128,128], index: 3, kind: input, shape index: {}]   ;;  %s1172_s4 = inlined_call_operand.vmem [shape: f32[1,128], index: 4, kind: input, shape index: {}]   ;;  %s1173_s5 = inlined_call_operand.hbm [shape: f32[128,256], index: 5, kind: input, shape index: {}]   ;;  %s1174_s6 = inlined_call_operand.vmem [shape: f32[1,256], index: 6, kind: input, shape index: {}]   ;;  %s1175_s7 = inlined_call_operand.hbm [shape: f32[256,128], index: 7, kind: input, shape index: {}]   ;;  %s1176_s8 = inlined_call_operand.vmem [shape: f32[1,128], index: 8, kind: input, shape index: {}]   ;;  %s1177_s9 = inlined_call_operand.hbm [shape: f32[24,128], index: 9, kind: output, shape index: {}]  }
   0x1   :  { %1179 = sst [smem:[#allocation14_spill]] %s1171_s3 }
   0x2   :  { %1180 = sst [smem:[#allocation15_spill]] %s1173_s5 }
   0x3   :  { %14 = vsyncpa [#allocation3], 0 }
   0x4   :  { %15 = vsyncpa [#allocation6], 0 }
   0x5   :  { %16 = vsyncpa [#allocation4], 0 }
   0x6   :  { %18 = vsyncpa [#allocation4 + $0x1], 0  ;;  %s1027_s30 = smov 0   ;;  %s1029_s10 = smov 0  }
   0x7   :  { %s1031_s11 = smov 0   ;;  %s1033_s12 = smov 0  }
   0x8 LB: > { %1181 = sst [smem:[#allocation12_spill]] %s964_s11  ;;  %s1048_s13 = sadd.s32 4294967295, %s968_s12   ;;  %s968_s12 = sphi %s1033_s12, %s1193_s12   ;;  %s964_s11 = sphi %s1031_s11, %s1190_s11   ;;  %s960_s10 = sphi %s1029_s10, %s1192_s10   ;;  %s956_s30 = sphi %s1027_s30, %s1191_s30  }
   0x9   : > { %s714_s14 = sadd.s32 4294967294, %s968_s12   ;;  %s1052_s15 = sadd.s32 1, %s968_s12  }
   0xa   : > { %s225_s16 = sadd.s32 1, %s964_s11  ;;  %s222_s17 = ssub.s32 %s968_s12, %s1052_s15 }
   0xb   : > { %p235_p0 = scmp.ne.s32.totalorder %s964_s11, %s960_s10  ;;  %p223_p1 = scmp.eq.s32.totalorder %s222_s17, 0 }
   0xc   : > { %p236_p2 = scmp.eq.s32.totalorder %s1048_s13, 2  ;;  %p241_p3 = scmp.ne.s32.totalorder %s960_s10, %s956_s30 }
   0xd   : > { %p242_p4 = scmp.eq.s32.totalorder %s714_s14, 2  ;;  %p715_p7 = scmp.ge.s32.totalorder %s968_s12, 1 }
   0xe   : > { %s1063_s18 = scalar_select %p223_p1, %s964_s11, %s225_s16  }
   0xf   : > { %p1065_p5 = por %p236_p2, %p235_p0  ;;  %p1069_p6 = por %p242_p4, %p241_p3 }
  0x10   : > { %1182 = sst [smem:[#allocation13_spill]] %s1063_s18  ;;  %p249_p8 = scmp.lt.s32.totalorder %s968_s12, 4 }
  0x11   : > { %p759_p9 = scmp.eq.s32.totalorder %s1048_s13, 0  ;;  %s1186_s5 = sld [smem:[#allocation15_spill]] }
  0x12   : > { %p1076_p10 = pnand %p715_p7, %p249_p8  ;;  %s970_s25 = smov [#allocation5]  }
  0x13   : > { %s285_s26 = sshll.u32 %s970_s25, 4  ;;  %s1188_s3 = sld [smem:[#allocation14_spill]]  ;;  %s286_s26 = int_to_ptr.vmem [resolvable:$true] %s285_s26 }
  0x14   : > { %p745_p11 = pneg %p1076_p10  ;;  %s971_s16 = smov 256  }
  0x15   : > { %s972_s17 = smov 16   ;;  %s973_s22 = smov [#allocation2]  }
  0x16   : > { %p1087_p12 = pnand %p759_p9, %p745_p11  ;;  %s268_s23 = sshll.u32 %s973_s22, 4  ;;  %s269_s23 = int_to_ptr.vmem [resolvable:$true] %s268_s23 }
  0x17   : > { %s283_s24 = sshll.u32 %s1186_s5, 4  ;;  %s974_s25 = smov 128   ;;  %s284_s24 = int_to_ptr.hbm [resolvable:$true] %s283_s24 }
  0x18   : > { %751 = dma.hbm_to_vmem [thread:$0]  (!%p1087_p12), %s284_s24, 4096, %s286_s26, [#allocation6], %s971_s16, %s971_s16, %s972_s17  }
  0x19   : > { %s266_s14 = sshll.u32 %s1188_s3, 4  ;;  %s975_s5 = smov 8   ;;  %s267_s14 = int_to_ptr.hbm [resolvable:$true] %s266_s14 }
  0x1a   : > { %748 = dma.hbm_to_vmem [thread:$0]  (!%p1087_p12), %s267_s14, 2048, %s269_s23, [#allocation3], %s974_s25, %s974_s25, %s975_s5  }
  0x1b   : > { %s300_s28 = sshll.u32 %s1175_s7, 4  ;;  %s976_s29 = smov [#allocation7]   ;;  %s301_s28 = int_to_ptr.hbm [resolvable:$true] %s300_s28 }
  0x1c   : > { %s302_s3 = sshll.u32 %s976_s29, 4  ;;  %328 = sbr.rel (%p1076_p10) target bundleno = 572 (0x23c), region = 56  ;;  %s303_s3 = int_to_ptr.vmem [resolvable:$true] %s302_s3 }
  0x1d   : > { %754 = dma.hbm_to_vmem [thread:$0]  (!%p1087_p12), %s301_s28, 4096, %s303_s3, [#allocation6], %s974_s25, %s974_s25, %s975_s5  }
  0x21   : > { %943 = dma.done.wait (%p759_p9), [#allocation3], 2048  }
  0x22   : > { %945 = vsyncadd (%p759_p9), [#allocation3], 4294965248 }
  0x23   : > { %947 = dma.done.wait (%p759_p9), [#allocation6], 8192  }
  0x24   : > { %949 = vsyncadd (%p759_p9), [#allocation6], 4294959104  ;;  %p374_p13 = scmp.lt.s32.totalorder %s1048_s13, 2  ;;  %v380_v0 = vld [vmem:[%s1169_s1 + $0x8] sm:$0xff]  ;;  %v379_v1 = vld [vmem:[%s1169_s1] sm:$0xff]  ;;  %vm385_vm0 = vcmask 130048  }
  0x25   : > { %403 = vmatpush.msra.mxu0 %v380_v0  ;;  %v425_v3 = vld [vmem:[#allocation2 + $0x78] sm:$0xff]  ;;  %v424_v4 = vld [vmem:[#allocation2 + $0x70] sm:$0xff]  ;;  %v423_v5 = vld [vmem:[#allocation2 + $0x68] sm:$0xff]  ;;  %s371_s29 = sand.u32 1, %s960_s10   ;;  %s918_s28 = scalar_lea.hbm %s1177_s9, 24 }
  0x26   : > { %s375_s11 = scalar_select %p374_p13, %s1048_s13, 2  ;;  %430 = vmatpush.msra.mxu1 %v425_v3  ;;  %v422_v6 = vld [vmem:[#allocation2 + $0x60] sm:$0xff]  ;;  %v421_v7 = vld [vmem:[#allocation2 + $0x58] sm:$0xff]  ;;  %v420_v8 = vld [vmem:[#allocation2 + $0x50] sm:$0xff] }
  0x27   : > { %404 = vmatpush.msra.mxu0 %v379_v1  ;;  %v419_v9 = vld [vmem:[#allocation2 + $0x48] sm:$0xff]  ;;  %v418_v10 = vld [vmem:[#allocation2 + $0x40] sm:$0xff]  ;;  %v417_v11 = vld [vmem:[#allocation2 + $0x38] sm:$0xff] }
  0x28   : > { %s725_s3 = sshll.u32 %s375_s11, 3  ;;  %431 = vmatpush.msra.mxu1 %v424_v4  ;;  %v416_v12 = vld [vmem:[#allocation2 + $0x30] sm:$0xff]  ;;  %v415_v13 = vld [vmem:[#allocation2 + $0x28] sm:$0xff]  ;;  %v414_v14 = vld [vmem:[#allocation2 + $0x20] sm:$0xff]  ;;  %s724_s11 = sshll.u32 %s371_s29, 3 }
  0x29   : > { %s377_s21 = scalar_lea.vmem %s1168_s0, %s725_s3  ;;  %v413_v15 = vld [vmem:[#allocation2 + $0x18] sm:$0xff]  ;;  %v412_v16 = vld [vmem:[#allocation2 + $0x10] sm:$0xff]  ;;  %v411_v17 = vld [vmem:[#allocation2 + $0x8] sm:$0xff]  ;;  %s728_s3 = sshll.u32 %s1048_s13, 3 }
  0x2a   : > { %v378_v2 = vld [vmem:[%s377_s21] sm:$0xff]  ;;  %432 = vmatpush.msra.mxu1 %v423_v5  ;;  %v481_v19 = vld [vmem:[#allocation5 + $0xf0] sm:$0xff]  ;;  %v482_v20 = vld [vmem:[#allocation5 + $0xf8] sm:$0xff]  ;;  %s619_s26 = scalar_lea.hbm %s1177_s9, %s728_s3  ;;  %s373_s27 = scalar_lea.vmem [#allocation8], %s724_s11 }
  0x2b   : > { %726 = vmatmul.msk.f32.vlgmr.msra.gmra.mxu0 %vm385_vm0, %v378_v2  ;;  %v410_v18 = vld [vmem:[#allocation2] sm:$0xff]  ;;  %489 = vmatpush.msra.mxu2 %v481_v19  ;;  %v480_v22 = vld [vmem:[#allocation5 + $0xe8] sm:$0xff]  ;;  %v477_v23 = vld [vmem:[#allocation5 + $0xd0] sm:$0xff]  ;;  %s621_s14 = sshll.u32 %s373_s27, 4  ;;  %s623_s16 = sshll.u32 %s619_s26, 4  ;;  %s622_s14 = int_to_ptr.vmem [resolvable:$true] %s621_s14  ;;  %s624_s16 = int_to_ptr.hbm [resolvable:$true] %s623_s16 }
  0x2c   : > { %433 = vmatpush.msra.mxu1 %v422_v6  ;;  %v479_v21 = vld [vmem:[#allocation5 + $0xe0] sm:$0xff]  ;;  %509 = vmatpush.msra.mxu3 %v482_v20  ;;  %v478_v24 = vld [vmem:[#allocation5 + $0xd8] sm:$0xff]  ;;  %v476_v26 = vld [vmem:[#allocation5 + $0xc8] sm:$0xff]  ;;  %s609_s13 = scalar_lea.sflag [#allocation4], %s371_s29  ;;  %s912_s17 = sshra.s32 %s624_s16, 4  ;;  %s913_s17 = int_to_ptr.hbm [resolvable:$true] %s912_s17 }
  0x2d   : > { %490 = vmatpush.msra.mxu2 %v479_v21  ;;  %v475_v25 = vld [vmem:[#allocation5 + $0xc0] sm:$0xff]  ;;  %v473_v27 = vld [vmem:[#allocation5 + $0xb0] sm:$0xff]  ;;  %v474_v28 = vld [vmem:[#allocation5 + $0xb8] sm:$0xff]  ;;  %s914_s22 = scalar_lea.hbm %s913_s17, 8  ;;  %p919_p3 = scmp.lt.s32.totalorder %s913_s17, %s1177_s9 }
  0x2e   : > { %434 = vmatpush.msra.mxu1 %v421_v7  ;;  %510 = vmatpush.msra.mxu3 %v480_v22  ;;  %v471_v29 = vld [vmem:[#allocation5 + $0xa0] sm:$0xff]  ;;  %v472_v30 = vld [vmem:[#allocation5 + $0xa8] sm:$0xff]  ;;  %v469_v31 = vld [vmem:[#allocation5 + $0x90] sm:$0xff]  ;;  %p915_p0 = scmp.ne.s32.totalorder %s913_s17, %s914_s22  ;;  %p920_p4 = scmp.lt.s32.totalorder %s918_s28, %s914_s22 }
  0x2f   : > { %491 = vmatpush.msra.mxu2 %v477_v23  ;;  %v470_v32 = vld [vmem:[#allocation5 + $0x98] sm:$0xff]  ;;  %v467_v33 = vld [vmem:[#allocation5 + $0x80] sm:$0xff]  ;;  %v468_v34 = vld [vmem:[#allocation5 + $0x88] sm:$0xff] }
  0x30   : > { %435 = vmatpush.msra.mxu1 %v420_v8  ;;  %511 = vmatpush.msra.mxu3 %v478_v24  ;;  %v465_v35 = vld [vmem:[#allocation5 + $0x70] sm:$0xff]  ;;  %v466_v36 = vld [vmem:[#allocation5 + $0x78] sm:$0xff]  ;;  %v463_v37 = vld [vmem:[#allocation5 + $0x60] sm:$0xff]  ;;  %p916_p1 = pnand %p915_p0, %p1065_p5  ;;  %p921_p7 = por %p920_p4, %p919_p3 }
  0x31   : > { %492 = vmatpush.msra.mxu2 %v475_v25  ;;  %v464_v38 = vld [vmem:[#allocation5 + $0x68] sm:$0xff]  ;;  %v461_v39 = vld [vmem:[#allocation5 + $0x50] sm:$0xff]  ;;  %v462_v40 = vld [vmem:[#allocation5 + $0x58] sm:$0xff] }
  0x32   : > { %436 = vmatpush.msra.mxu1 %v419_v9  ;;  %512 = vmatpush.msra.mxu3 %v476_v26  ;;  %v459_v41 = vld [vmem:[#allocation5 + $0x40] sm:$0xff]  ;;  %v460_v42 = vld [vmem:[#allocation5 + $0x48] sm:$0xff]  ;;  %v457_v43 = vld [vmem:[#allocation5 + $0x30] sm:$0xff]  ;;  %p917_p2 = pneg %p916_p1 }
  0x33   : > { %493 = vmatpush.msra.mxu2 %v473_v27  ;;  %v458_v44 = vld [vmem:[#allocation5 + $0x38] sm:$0xff]  ;;  %v805_v45 = vld [vmem:[%s1170_s2] ss:$0 sm:$0xff]  ;;  %v456_v50 = vld [vmem:[#allocation5 + $0x28] sm:$0xff] }
  0x34   : > { %437 = vmatpush.msra.mxu1 %v418_v10  ;;  %513 = vmatpush.msra.mxu3 %v474_v28  ;;  %v455_v49 = vld [vmem:[#allocation5 + $0x20] sm:$0xff]  ;;  %v453_v51 = vld [vmem:[#allocation5 + $0x10] sm:$0xff]  ;;  %v454_v52 = vld [vmem:[#allocation5 + $0x18] sm:$0xff]  ;;  %p922_p8 = pnand %p921_p7, %p917_p2 }
  0x35   : > { %494 = vmatpush.msra.mxu2 %v471_v29  ;;  %v451_v53 = vld [vmem:[#allocation5] sm:$0xff]  ;;  %v452_v54 = vld [vmem:[#allocation5 + $0x8] sm:$0xff]  ;;  %v546_v55 = vld [vmem:[#allocation7 + $0x78] sm:$0xff] }
  0x36   : > { %438 = vmatpush.msra.mxu1 %v417_v11  ;;  %514 = vmatpush.msra.mxu3 %v472_v30  ;;  %v562_v56 = vld [vmem:[#allocation7 + $0xf8] sm:$0xff]  ;;  %v545_v57 = vld [vmem:[#allocation7 + $0x70] sm:$0xff]  ;;  %v544_v59 = vld [vmem:[#allocation7 + $0x68] sm:$0xff] }
  0x37   : > { %495 = vmatpush.msra.mxu2 %v469_v31  ;;  %567 = vmatpush.msrb.mxu0 %v546_v55  ;;  %v561_v58 = vld [vmem:[#allocation7 + $0xf0] sm:$0xff]  ;;  %v560_v60 = vld [vmem:[#allocation7 + $0xe8] sm:$0xff]  ;;  %v543_v61 = vld [vmem:[#allocation7 + $0x60] sm:$0xff] }
  0x38   : > { %439 = vmatpush.msra.mxu1 %v416_v12  ;;  %515 = vmatpush.msra.mxu3 %v470_v32  ;;  %v559_v62 = vld [vmem:[#allocation7 + $0xe0] sm:$0xff]  ;;  %v542_v63 = vld [vmem:[#allocation7 + $0x58] sm:$0xff]  ;;  %v541_v1 = vld [vmem:[#allocation7 + $0x50] sm:$0xff] }
  0x39   : > { %496 = vmatpush.msra.mxu2 %v467_v33  ;;  %568 = vmatpush.msrb.mxu0 %v545_v57  ;;  %v558_v0 = vld [vmem:[#allocation7 + $0xd8] sm:$0xff]  ;;  %v557_v2 = vld [vmem:[#allocation7 + $0xd0] sm:$0xff]  ;;  %v540_v3 = vld [vmem:[#allocation7 + $0x48] sm:$0xff] }
  0x3a   : > { %440 = vmatpush.msra.mxu1 %v415_v13  ;;  %516 = vmatpush.msra.mxu3 %v468_v34  ;;  %v556_v4 = vld [vmem:[#allocation7 + $0xc8] sm:$0xff]  ;;  %v539_v5 = vld [vmem:[#allocation7 + $0x40] sm:$0xff]  ;;  %v538_v7 = vld [vmem:[#allocation7 + $0x38] sm:$0xff] }
  0x3b   : > { %497 = vmatpush.msra.mxu2 %v465_v35  ;;  %569 = vmatpush.msrb.mxu0 %v544_v59  ;;  %v555_v6 = vld [vmem:[#allocation7 + $0xc0] sm:$0xff]  ;;  %v554_v8 = vld [vmem:[#allocation7 + $0xb8] sm:$0xff]  ;;  %v537_v9 = vld [vmem:[#allocation7 + $0x30] sm:$0xff] }
  0x3c   : > { %441 = vmatpush.msra.mxu1 %v414_v14  ;;  %517 = vmatpush.msra.mxu3 %v466_v36  ;;  %v553_v10 = vld [vmem:[#allocation7 + $0xb0] sm:$0xff]  ;;  %v536_v11 = vld [vmem:[#allocation7 + $0x28] sm:$0xff]  ;;  %v535_v13 = vld [vmem:[#allocation7 + $0x20] sm:$0xff] }
  0x3d   : > { %498 = vmatpush.msra.mxu2 %v463_v37  ;;  %570 = vmatpush.msrb.mxu0 %v543_v61  ;;  %v552_v12 = vld [vmem:[#allocation7 + $0xa8] sm:$0xff]  ;;  %v551_v14 = vld [vmem:[#allocation7 + $0xa0] sm:$0xff]  ;;  %v533_v21 = vld [vmem:[#allocation7 + $0x10] sm:$0xff] }
  0x3e   : > { %442 = vmatpush.msra.mxu1 %v413_v15  ;;  %518 = vmatpush.msra.mxu3 %v464_v38  ;;  %v534_v15 = vld [vmem:[#allocation7 + $0x18] sm:$0xff]  ;;  %v549_v22 = vld [vmem:[#allocation7 + $0x90] sm:$0xff]  ;;  %v532_v23 = vld [vmem:[#allocation7 + $0x8] sm:$0xff] }
  0x3f   : > { %499 = vmatpush.msra.mxu2 %v461_v39  ;;  %571 = vmatpush.msrb.mxu0 %v542_v63  ;;  %v548_v24 = vld [vmem:[#allocation7 + $0x88] sm:$0xff]  ;;  %v531_v25 = vld [vmem:[#allocation7] sm:$0xff] }
  0x40   : > { %443 = vmatpush.msra.mxu1 %v412_v16  ;;  %519 = vmatpush.msra.mxu3 %v462_v40  ;;  %v550_v16 = vld [vmem:[#allocation7 + $0x98] sm:$0xff]  ;;  %v547_v26 = vld [vmem:[#allocation7 + $0x80] sm:$0xff] }
  0x41   : > { %500 = vmatpush.msra.mxu2 %v459_v41  ;;  %572 = vmatpush.msrb.mxu0 %v541_v1  ;;  %v483_v27 = vld [vmem:[%s1174_s6] sm:$0x3] }
  0x42   : > { %444 = vmatpush.msra.mxu1 %v411_v17  ;;  %520 = vmatpush.msra.mxu3 %v460_v42  ;;  %v806_v17 = vld [vmem:[%s1172_s4] ss:$0 sm:$0xff]  ;;  %v485_v28 = vperm.slane %v483_v27, 0  ;;  %v486_v29 = vperm.slane %v483_v27, 1 }
  0x43   : > { %501 = vmatpush.msra.mxu2 %v457_v43  ;;  %573 = vmatpush.msrb.mxu0 %v540_v3  ;;  %v807_v36 = vld [vmem:[%s1176_s8] ss:$0 sm:$0xff] }
  0x44   : > { %445 = vmatpush.msra.mxu1 %v410_v18  ;;  %521 = vmatpush.msra.mxu3 %v458_v44 }
  0x45   : > { %502 = vmatpush.msra.mxu2 %v455_v49  ;;  %574 = vmatpush.msrb.mxu0 %v539_v5 }
  0x46   : > { %522 = vmatpush.msra.mxu3 %v456_v50  ;;  %587 = vmatpush.msrb.mxu1 %v562_v56 }
  0x47   : > { %503 = vmatpush.msra.mxu2 %v453_v51  ;;  %575 = vmatpush.msrb.mxu0 %v538_v7 }
  0x48   : > { %523 = vmatpush.msra.mxu3 %v454_v52  ;;  %588 = vmatpush.msrb.mxu1 %v561_v58 }
  0x49   : > { %504 = vmatpush.msra.mxu2 %v451_v53  ;;  %576 = vmatpush.msrb.mxu0 %v537_v9 }
  0x4a   : > { %524 = vmatpush.msra.mxu3 %v452_v54  ;;  %589 = vmatpush.msrb.mxu1 %v560_v60 }
  0x4b   : > { %577 = vmatpush.msrb.mxu0 %v536_v11 }
  0x4c   : > { %590 = vmatpush.msrb.mxu1 %v559_v62 }
  0x4d   : > { %578 = vmatpush.msrb.mxu0 %v535_v13 }
  0x4e   : > { %591 = vmatpush.msrb.mxu1 %v558_v0 }
  0x4f   : > { %579 = vmatpush.msrb.mxu0 %v534_v15 }
  0x50   : > { %592 = vmatpush.msrb.mxu1 %v557_v2 }
  0x51   : > { %580 = vmatpush.msrb.mxu0 %v533_v21 }
  0x52   : > { %593 = vmatpush.msrb.mxu1 %v556_v4 }
  0x53   : > { %581 = vmatpush.msrb.mxu0 %v532_v23 }
  0x54   : > { %594 = vmatpush.msrb.mxu1 %v555_v6 }
  0x55   : > { %582 = vmatpush.msrb.mxu0 %v531_v25 }
  0x56   : > { %595 = vmatpush.msrb.mxu1 %v554_v8 }
  0x58   : > { %596 = vmatpush.msrb.mxu1 %v553_v10 }
  0x5a   : > { %597 = vmatpush.msrb.mxu1 %v552_v12 }
  0x5c   : > { %598 = vmatpush.msrb.mxu1 %v551_v14 }
  0x5e   : > { %599 = vmatpush.msrb.mxu1 %v550_v16 }
  0x60   : > { %600 = vmatpush.msrb.mxu1 %v549_v22 }
  0x62   : > { %601 = vmatpush.msrb.mxu1 %v548_v24 }
  0x64   : > { %602 = vmatpush.msrb.mxu1 %v547_v26 }
  0xa8   : > { %v406_v46 = vpop.f32.mrf.mxu0 }
  0xa9   : > { %v407_v47 = vadd.f32 %v805_v45, %v406_v46 }
  0xab   : > { %v409_v48 = vmax.f32 %v407_v47, 0.0 }
  0xad   : > { %446 = vmatmul.f32.vlgmr.msra.gmra.mxu1 %v409_v48 }
 0x12a   : > { %v447_v18 = vpop.f32.mrf.mxu1 }
 0x12b   : > { %v448_v19 = vadd.f32 %v806_v17, %v447_v18 }
 0x12d   : > { %v450_v20 = vmax.f32 %v448_v19, 0.0 }
 0x12f   : > { %505 = vmatmul.f32.vlgmr.msra.gmra.mxu2 %v450_v20  ;;  %525 = vmatmul.f32.vlgmr.msra.gmra.mxu3 %v450_v20 }
 0x1b2   : > { %v506_v30 = vpop.f32.mrf.mxu2  ;;  %v526_v31 = vpop.f32.mrf.mxu3 }
 0x1b3   : > { %v507_v32 = vadd.f32 %v506_v30, %v485_v28  ;;  %v527_v33 = vadd.f32 %v526_v31, %v486_v29 }
 0x1b5   : > { %v529_v34 = vmax.f32 %v507_v32, 0.0  ;;  %v530_v35 = vmax.f32 %v527_v33, 0.0 }
 0x1b7   : > { %583 = vmatmul.f32.vlgmr.msrb.gmra.mxu0 %v529_v34  ;;  %603 = vmatmul.f32.vlgmr.msrb.gmra.mxu1 %v530_v35 }
 0x234   : > { %v584_v37 = vpop.f32.mrf.mxu0  ;;  %v604_v39 = vpop.f32.mrf.mxu1 }
 0x235   : > { %v585_v38 = vadd.f32 %v807_v36, %v584_v37 }
 0x237   : > { %v605_v40 = vadd.f32 %v604_v39, %v585_v38 }
 0x239   : > { %607 = vst [vmem:[%s373_s27] sm:$0xff] %v605_v40 }
 0x23a   : > { %925 = shalt.err (!%p922_p8)
}
 0x23b   : > { %743 = dma.vmem_to_hbm [thread:$0]  (%p1065_p5), %s622_s14, 128, %s624_s16, %s609_s13  }
 0x23c PF: > { %p765_p9 = scmp.ge.s32.totalorder %s968_s12, 2  ;;  %s635_s29 = sand.u32 1, %s956_s30  }
 0x23d   : > { %s636_s5 = scalar_lea.sflag [#allocation4], %s635_s29 }
 0x23e   : > { %p756_p10 = pnand %p765_p9, %p1069_p6 }
 0x240   : > { %p757_p11 = pneg %p756_p10 }
 0x242   : > { %951 = dma.done.wait (%p757_p11), %s636_s5, 128  }
 0x243   : > { %953 = vsyncadd (%p757_p11), %s636_s5, 4294967168  ;;  %s1189_s18 = sld [smem:[#allocation12_spill]]  ;;  %p21_p12 = scmp.ge.s32.totalorder %s1052_s15, 5  }
 0x244   : > { %s1190_s11 = sld [smem:[#allocation13_spill]]  ;;  %s1191_s30 = smov %s960_s10 }
 0x245   : > { %s1193_s12 = smov %s1052_s15  ;;  %23 = sbr.rel (!%p21_p12) target bundleno = 8 (0x8), region = 104 }
 0x249   : > { %s1192_s10 = smov %s1189_s18 }
 0x24a   :  { %642 = vsyncpa [#allocation3], 1 }
 0x24b   :  { %644 = vsyncpa [#allocation3 + $0x1], 1 }
 0x24c   :  { %645 = vsyncpa [#allocation6], 1 }
 0x24d   :  { %646 = vsyncpa [#allocation4], 1 }
 0x24e   :  { %648 = vsyncpa [#allocation4 + $0x1], 1 }

</bundles_post_ra>
